<compile_context>
chip_gen: v6e
topology: v6e:2x2x1
jax: 0.10.0
libtpu: 0.0.40
codegen_flags: <defaults>
</compile_context>

<pallas_src>
import numpy as np
import jax
import jax.numpy as jnp
from jax import lax
from jax.experimental import pallas as pl
from jax.experimental.pallas import tpu as pltpu

SUBLANE = 8
EPS = 1e-5


def _round_up(a, m):
    return ((a + m - 1) // m) * m


# ----------------------------------------------------------------------------
# Pallas kernel: two small MXU dots off one VMEM-resident x tile + epilogue.
# ----------------------------------------------------------------------------
def ei_homeo_kernel(x_ref, weff_ref, bixT_ref, beiT_ref, bias_ref, out_ref):
    # x may be streamed as bf16 to halve HBM reads; all math accumulates in f32.
    x = x_ref[...].astype(jnp.float32)                                # [TB, n_input]

    # Subtractive E/I path, algebraically fused (exact at inference):
    #   x@Wex.T + b.T - (x@Wix.T)@Wei.T == x @ (Wex.T - Wix.T@Wei.T) + b.T
    z = jnp.dot(x, weff_ref[...], preferred_element_type=jnp.float32)  # [TB, ne]
    z = z + bias_ref[...]

    # Homeostatic divisive path: b_hi = (x @ Bix.T)^2 ; z_d^2 = b_hi @ Bei.T
    b_hi = jnp.dot(x, bixT_ref[...], preferred_element_type=jnp.float32)  # [TB, ne]
    b_hi = b_hi * b_hi
    # NOTE: if Bei is guaranteed to stay uniform (1/ne) at inference, this matmul
    # could become a row-reduce; kept general because Bei is a module parameter.
    z_d_sq = jnp.dot(b_hi, beiT_ref[...], preferred_element_type=jnp.float32)

    # h = z / sqrt(z_d^2 + eps)   (nonlinearity=None); rsqrt uses the EUP slot.
    out_ref[...] = z * lax.rsqrt(z_d_sq + EPS)


# ----------------------------------------------------------------------------
# Once-per-model parameter prep (hoisted out of the per-call path).
# ----------------------------------------------------------------------------
def prepare_params(Wex, Wix, Wei, Bix, Bei, bias):
    ne, n_input = Wex.shape

    Wex = jnp.asarray(Wex, jnp.float32)
    Wix = jnp.asarray(Wix, jnp.float32)
    Wei = jnp.asarray(Wei, jnp.float32)
    Bix = jnp.asarray(Bix, jnp.float32)
    Bei = jnp.asarray(Bei, jnp.float32)
    bias = jnp.asarray(bias, jnp.float32)

    # Effective subtractive-inhibition weight (exact at inference):
    #   x @ Wex.T - (x @ Wix.T) @ Wei.T == x @ (Wex.T - Wix.T @ Wei.T)
    W_eff = Wex.T - Wix.T @ Wei.T                 # [n_input, ne]
    BixT = Bix.T                                  # [n_input, ne]
    BeiT = Bei.T                                  # [ne, ne]
    b_row = bias.T                                # [1, ne]

    return {
        "W_eff": W_eff,
        "BixT": BixT,
        "BeiT": BeiT,
        "bias_row": b_row,
        "ne": ne,
        "n_input": n_input,
    }


# ----------------------------------------------------------------------------
# Batch tile selection: multiple of 8, >=2 grid steps when there is enough work
# (v7x megacore), padding only up to the nearest TB multiple.
# ----------------------------------------------------------------------------
def _choose_batch_tile(B, max_batch_tile):
    max_batch_tile = _round_up(max(max_batch_tile, SUBLANE), SUBLANE)
    B8 = _round_up(max(B, 1), SUBLANE)
    n_steps = max(1, pl.cdiv(B8, max_batch_tile))
    if B8 >= 2 * SUBLANE:
        # Ensure >=2 grid steps so the "parallel" batch axis can shard across
        # v7x's two TensorCores (no-op on single-TC v5e/v6e).
        n_steps = max(n_steps, 2)
    TB = _round_up(pl.cdiv(B8, n_steps), SUBLANE)
    B_pad = _round_up(max(B, SUBLANE), TB)
    return TB, B_pad


# ----------------------------------------------------------------------------
# Forward wrapper: batch-streamed grid, weights VMEM-resident across iterations.
# ----------------------------------------------------------------------------
def ei_dense_homeostatic_forward(x, params, max_batch_tile=2048,
                                 activation_dtype=jnp.float32):
    W_eff = params["W_eff"]
    BixT = params["BixT"]
    BeiT = params["BeiT"]
    bias_row = params["bias_row"]
    ne = params["ne"]
    n_input = params["n_input"]

    B = x.shape[0]
    assert x.shape[1] == n_input

    TB, B_pad = _choose_batch_tile(B, max_batch_tile)

    x_p = jnp.asarray(x, activation_dtype)
    if B_pad != B:
        # Padding is at most a handful of rows per grid step (TB adapts to B).
        x_p = jnp.pad(x_p, ((0, B_pad - B), (0, 0)))

    grid = (B_pad // TB,)

    # Scoped-VMEM budget: double-buffered x/out tiles + resident weights +
    # f32 intermediates; generous margin, capped well under v7x's 64 MiB physical.
    act_bytes = jnp.dtype(activation_dtype).itemsize
    vmem_est = (2 * TB * n_input * act_bytes            # x double buffer
                + 2 * TB * ne * 4                        # out double buffer
                + TB * (n_input + 6 * ne) * 4            # in-kernel f32 temps
                + 8 * n_input * ne * 4 + (1 << 20))      # weights + slack
    vmem_limit = int(min(max(2 * vmem_est, 16 << 20), 48 << 20))

    out_p = pl.pallas_call(
        ei_homeo_kernel,
        out_shape=jax.ShapeDtypeStruct((B_pad, ne), jnp.float32),
        grid_spec=pltpu.PrefetchScalarGridSpec(
            num_scalar_prefetch=0,
            grid=grid,
            in_specs=[
                # x streams over the batch grid (double-buffered by the pipeline).
                pl.BlockSpec((TB, n_input), lambda i: (i, 0)),
                # Weights: same block every iteration -> stay VMEM-resident.
                pl.BlockSpec((n_input, ne), lambda i: (0, 0)),
                pl.BlockSpec((n_input, ne), lambda i: (0, 0)),
                pl.BlockSpec((ne, ne), lambda i: (0, 0)),
                pl.BlockSpec((1, ne), lambda i: (0, 0)),
            ],
            # Last block dim equals the full array dim (ne) -> legal, and the
            # HBM writeback is ne-wide instead of 128-padded.
            out_specs=pl.BlockSpec((TB, ne), lambda i: (i, 0)),
        ),
        compiler_params=pltpu.CompilerParams(
            dimension_semantics=("parallel",),
            vmem_limit_bytes=vmem_limit,
        ),
    )(x_p, W_eff, BixT, BeiT, bias_row)

    return out_p if B_pad == B else out_p[:B]


# ----------------------------------------------------------------------------
# Deterministic parameter init mirroring EiDenseLayerDecoupledHomeostatic.init_weights
# (lognormal Wex/Wei, Wix = mean-row copies, SVD-derived Bix, Bei = 1/ne).
# ----------------------------------------------------------------------------
def init_params(n_input, ne, ni, numerator=2, k=1, seed=0):
    rng = np.random.default_rng(seed)

    def calc_ln_mu_sigma(mean, var):
        mu_ln = np.log(mean ** 2 / np.sqrt(mean ** 2 + var))
        sigma_ln = np.sqrt(np.log(1 + var / mean ** 2))
        return mu_ln, sigma_ln

    target_std_wex = np.sqrt(numerator * ne / (n_input * (ne - 1)))
    mu, sigma = calc_ln_mu_sigma(target_std_wex * k, target_std_wex ** 2)

    Wex = rng.lognormal(mu, sigma, size=(ne, n_input))
    Wei = rng.lognormal(mu, sigma, size=(ne, ni))
    Wei /= Wei.sum(axis=1, keepdims=True)
    Wix = np.ones((ni, 1)) * Wex.mean(axis=0, keepdims=True)

    W = Wex - Wei @ Wix
    _, S, V_T = np.linalg.svd(W)
    V = V_T[:ne].T
    Bix = np.diag(S) @ V.T
    Bei = np.ones((ne, ne)) / ne

    bias = np.zeros((ne, 1))  # use_bias=True, split_bias=False

    f32 = lambda a: jnp.asarray(a, dtype=jnp.float32)
    return f32(Wex), f32(Wix), f32(Wei), f32(Bix), f32(Bei), f32(bias)


def reference_forward(x, Wex, Wix, Wei, Bix, Bei, bias):
    hex_ = x @ Wex.T
    hi = x @ Wix.T
    inhibitory = hi @ Wei.T
    z = (hex_ + bias.T) - inhibitory
    b_hi = (x @ Bix.T) ** 2
    z_d = jnp.sqrt(b_hi @ Bei.T + 1e-5)
    return z / z_d


if __name__ == "__main__":
    # Small shapes consistent with the module: n_input >= ne, ni = 0.25*ne.
    batch, n_input, ne, ni = 24, 32, 16, 4

    Wex, Wix, Wei, Bix, Bei, bias = init_params(n_input, ne, ni, seed=0)
    params = prepare_params(Wex, Wix, Wei, Bix, Bei, bias)

    key = jax.random.PRNGKey(0)
    x = jax.random.normal(key, (batch, n_input), dtype=jnp.float32)

    out = ei_dense_homeostatic_forward(x, params)
    out = jax.block_until_ready(out)

    ref = reference_forward(x, Wex, Wix, Wei, Bix, Bei, bias)
    # Tolerance allows fp reassociation from the W_eff fusion and EUP rsqrt.
    np.testing.assert_allclose(np.asarray(out), np.asarray(ref), rtol=1e-4, atol=1e-4)

    print("KERNEL_OK")
</pallas_src>

<mosaic_0001>
module attributes {stable_mosaic.version = 11 : i64} {
  func.func @ei_homeo_kernel(%arg0: i32, %arg1: memref<16x32xf32, #tpu.memory_space<vmem>>, %arg2: memref<32x16xf32, #tpu.memory_space<vmem>>, %arg3: memref<32x16xf32, #tpu.memory_space<vmem>>, %arg4: memref<16x16xf32, #tpu.memory_space<vmem>>, %arg5: memref<1x16xf32, #tpu.memory_space<vmem>>, %arg6: memref<16x16xf32, #tpu.memory_space<vmem>>) attributes {dimension_semantics = [#tpu.dimension_semantics<parallel>], iteration_bounds = array<i64: 2>, scalar_prefetch = 0 : i64, scratch_operands = 0 : i64, tpu.core_type = #tpu.core_type<tc>, window_params = [{transform_indices = @transform_0, window_bounds = array<i64: 16, 32>}, {pipeline_mode = #tpu.pipeline_mode<synchronous>, transform_indices = @transform_1, window_bounds = array<i64: 32, 16>}, {pipeline_mode = #tpu.pipeline_mode<synchronous>, transform_indices = @transform_2, window_bounds = array<i64: 32, 16>}, {pipeline_mode = #tpu.pipeline_mode<synchronous>, transform_indices = @transform_3, window_bounds = array<i64: 16, 16>}, {pipeline_mode = #tpu.pipeline_mode<synchronous>, transform_indices = @transform_4, window_bounds = array<i64: 1, 16>}, {transform_indices = @transform_5, window_bounds = array<i64: 16, 16>}]} {
    %c0 = arith.constant 0 : index
    %c0_0 = arith.constant 0 : index
    %0 = vector.load %arg1[%c0, %c0_0] : memref<16x32xf32, #tpu.memory_space<vmem>>, vector<16x32xf32>
    %c0_1 = arith.constant 0 : index
    %c0_2 = arith.constant 0 : index
    %1 = vector.load %arg2[%c0_1, %c0_2] : memref<32x16xf32, #tpu.memory_space<vmem>>, vector<32x16xf32>
    %cst = arith.constant dense<0.000000e+00> : vector<16x16xf32>
    %2 = tpu.matmul %0, %1, %cst {dimension_numbers = #tpu.dot_dimension_numbers<[1], [0], [0], [1], [0, 0, 1, 1], [], []>} : vector<16x32xf32>, vector<32x16xf32>, vector<16x16xf32> -> vector<16x16xf32>
    %c0_3 = arith.constant 0 : index
    %c0_4 = arith.constant 0 : index
    %3 = vector.load %arg5[%c0_3, %c0_4] : memref<1x16xf32, #tpu.memory_space<vmem>>, vector<1x16xf32>
    %4 = vector.broadcast %3 : vector<1x16xf32> to vector<16x16xf32>
    %5 = arith.addf %2, %4 : vector<16x16xf32>
    %c0_5 = arith.constant 0 : index
    %c0_6 = arith.constant 0 : index
    %6 = vector.load %arg3[%c0_5, %c0_6] : memref<32x16xf32, #tpu.memory_space<vmem>>, vector<32x16xf32>
    %cst_7 = arith.constant dense<0.000000e+00> : vector<16x16xf32>
    %7 = tpu.matmul %0, %6, %cst_7 {dimension_numbers = #tpu.dot_dimension_numbers<[1], [0], [0], [1], [0, 0, 1, 1], [], []>} : vector<16x32xf32>, vector<32x16xf32>, vector<16x16xf32> -> vector<16x16xf32>
    %8 = arith.mulf %7, %7 : vector<16x16xf32>
    %c0_8 = arith.constant 0 : index
    %c0_9 = arith.constant 0 : index
    %9 = vector.load %arg4[%c0_8, %c0_9] : memref<16x16xf32, #tpu.memory_space<vmem>>, vector<16x16xf32>
    %cst_10 = arith.constant dense<0.000000e+00> : vector<16x16xf32>
    %10 = tpu.matmul %8, %9, %cst_10 {dimension_numbers = #tpu.dot_dimension_numbers<[1], [0], [0], [1], [0, 0, 1, 1], [], []>} : vector<16x16xf32>, vector<16x16xf32>, vector<16x16xf32> -> vector<16x16xf32>
    %cst_11 = arith.constant 9.99999974E-6 : f32
    %11 = vector.broadcast %cst_11 : f32 to vector<16x16xf32>
    %12 = arith.addf %10, %11 : vector<16x16xf32>
    %13 = math.rsqrt %12 : vector<16x16xf32>
    %14 = arith.mulf %5, %13 : vector<16x16xf32>
    %c0_12 = arith.constant 0 : index
    %c0_13 = arith.constant 0 : index
    %15 = vector.load %arg6[%c0_12, %c0_13] : memref<16x16xf32, #tpu.memory_space<vmem>>, vector<16x16xf32>
    tpu.vector_store %arg6[%c0_12, %c0_13], %14 {strides = array<i32>} : memref<16x16xf32, #tpu.memory_space<vmem>>, vector<16x16xf32>,
    return
  }
  func.func @transform_0(%arg0: i32) -> (i32, i32) {
    %c0_i32 = arith.constant 0 : i32
    %c0_i32_0 = arith.constant 0 : i32
    return %arg0, %c0_i32 : i32, i32
  }
  func.func @transform_1(%arg0: i32) -> (i32, i32) {
    %c0_i32 = arith.constant 0 : i32
    %c0_i32_0 = arith.constant 0 : i32
    %c0_i32_1 = arith.constant 0 : i32
    return %c0_i32, %c0_i32_0 : i32, i32
  }
  func.func @transform_2(%arg0: i32) -> (i32, i32) {
    %c0_i32 = arith.constant 0 : i32
    %c0_i32_0 = arith.constant 0 : i32
    %c0_i32_1 = arith.constant 0 : i32
    return %c0_i32, %c0_i32_0 : i32, i32
  }
  func.func @transform_3(%arg0: i32) -> (i32, i32) {
    %c0_i32 = arith.constant 0 : i32
    %c0_i32_0 = arith.constant 0 : i32
    %c0_i32_1 = arith.constant 0 : i32
    return %c0_i32, %c0_i32_0 : i32, i32
  }
  func.func @transform_4(%arg0: i32) -> (i32, i32) {
    %c0_i32 = arith.constant 0 : i32
    %c0_i32_0 = arith.constant 0 : i32
    %c0_i32_1 = arith.constant 0 : i32
    return %c0_i32, %c0_i32_0 : i32, i32
  }
  func.func @transform_5(%arg0: i32) -> (i32, i32) {
    %c0_i32 = arith.constant 0 : i32
    %c0_i32_0 = arith.constant 0 : i32
    return %arg0, %c0_i32 : i32, i32
  }
}

</mosaic_0001>

<bundles_post_ra>
// kernel: tpu_custom_call.1
= control target key start
LH: loop header
LB: loop body
LE: loop exit
PB: predicated region body
PF: predicated region fallthrough
CT: control target
= control target key end

     0   :  { %s663_s18 = smov 0   ;;  %s728_s0 = inlined_call_operand.vmem [shape: f32[32,32], index: 0, kind: input, shape index: {}]   ;;  %s729_s1 = inlined_call_operand.vmem [shape: f32[32,16], index: 1, kind: input, shape index: {}]   ;;  %s730_s2 = inlined_call_operand.vmem [shape: f32[32,16], index: 2, kind: input, shape index: {}]   ;;  %s731_s3 = inlined_call_operand.vmem [shape: f32[16,16], index: 3, kind: input, shape index: {}]   ;;  %s732_s4 = inlined_call_operand.vmem [shape: f32[1,16], index: 4, kind: input, shape index: {}]   ;;  %s733_s5 = inlined_call_operand.vmem [shape: f32[32,16], index: 5, kind: output, shape index: {}]  }
   0x1 LB: > { %s550_s19 = sadd.s32 4294967295, %s631_s18   ;;  %p554_p0 = scmp.ge.s32.totalorder %s631_s18, 1  ;;  %s631_s18 = sphi %s663_s18, %s15_s18  }
   0x2   : > { %p188_p1 = scmp.lt.s32.totalorder %s631_s18, 3 }
   0x4   : > { %p189_p2 = pnand %p554_p0, %p188_p1 }
   0x5   : > { %s555_s24 = sshll.u32 (!%p189_p2), %s550_s19, 1 }
   0x6   : > { %192 = sbr.rel (%p189_p2) target bundleno = 432 (0x1b0), region = 40  ;;  %p217_p3 = scmp.lt.s32.totalorder (!%p189_p2), %s555_s24, 3 }
   0xb   : > { %v326_v0 = vld [vmem:[%s730_s2 + $0x18] sm:$0xff]  ;;  %v325_v1 = vld [vmem:[%s730_s2 + $0x10] sm:$0xff]  ;;  %v324_v4 = vld [vmem:[%s730_s2 + $0x8] sm:$0xff]  ;;  %s735_s24 = smov (!%p217_p3, %s555_s24), 3  ;;  %vm241_vm0 = vcmask 261120   ;;  %vm406_vm1 = vcmask 130048  }
   0xc   : > { %595 = vmatprep.subr.mxu1 %v326_v0  ;;  %v233_v2 = vld [vmem:[%s729_s1 + $0x18] sm:$0xff]  ;;  %v232_v3 = vld [vmem:[%s729_s1 + $0x10] sm:$0xff]  ;;  %v231_v5 = vld [vmem:[%s729_s1 + $0x8] sm:$0xff]  ;;  %s556_s10 = sshll.u32 %s735_s24, 3 }
   0xd   : > { %596 = vmatpush3.msra.mxu1 %v326_v0  ;;  %584 = vmatprep.subr.mxu0 %v233_v2  ;;  %v323_v6 = vld [vmem:[%s730_s2] sm:$0xff]  ;;  %s220_s13 = scalar_lea.vmem %s728_s0, %s556_s10  ;;  %v405_v10 = vld [vmem:[%s731_s3 + $0x8] sm:$0xff]  ;;  %s226_s26 = scalar_lea.vmem %s733_s5, %s556_s10 }
   0xe   : > { %597 = vmatprep.subr.mxu1 %v325_v1  ;;  %585 = vmatpush3.msra.mxu0 %v233_v2  ;;  %v230_v7 = vld [vmem:[%s729_s1] sm:$0xff]  ;;  %v229_v9 = vld [vmem:[%s220_s13 + $0x8] sm:$0xff] }
   0xf   : > { %598 = vmatpush3.msra.mxu1 %v325_v1  ;;  %586 = vmatprep.subr.mxu0 %v232_v3  ;;  %v228_v8 = vld [vmem:[%s220_s13] sm:$0xff] }
  0x10   : > { %599 = vmatprep.subr.mxu1 %v324_v4  ;;  %587 = vmatpush3.msra.mxu0 %v232_v3  ;;  %v404_v11 = vld [vmem:[%s731_s3] sm:$0xff] }
  0x11   : > { %600 = vmatpush3.msra.mxu1 %v324_v4  ;;  %588 = vmatprep.subr.mxu0 %v231_v5  ;;  %v559_v22 = vld [vmem:[%s732_s4] ss:$0 sm:$0xff] }
  0x12   : > { %601 = vmatprep.subr.mxu1 %v323_v6  ;;  %589 = vmatpush3.msra.mxu0 %v231_v5 }
  0x13   : > { %602 = vmatpush3.msra.mxu1 %v323_v6  ;;  %603 = vmatprep.mubr.msk.f32.mxu1 %vm241_vm0, %v228_v8 }
  0x14   : > { %604 = vmatmul.mubr.msk.f32.vlgmr.msra.gmra.mxu1 %vm241_vm0, %v229_v9  ;;  %590 = vmatprep.subr.mxu0 %v230_v7 }
  0x15   : > { %591 = vmatpush3.msra.mxu0 %v230_v7  ;;  %592 = vmatprep.mubr.msk.f32.mxu0 %vm241_vm0, %v228_v8 }
  0x16   : > { %593 = vmatmul.mubr.msk.f32.vlgmr.msra.gmra.mxu0 %vm241_vm0, %v229_v9  ;;  %606 = vmatprep.subr.mxu0 %v405_v10 }
  0x17   : > { %607 = vmatpush3.msra.mxu0 %v405_v10 }
  0x18   : > { %608 = vmatprep.subr.mxu0 %v404_v11 }
  0x19   : > { %609 = vmatpush3.msra.mxu0 %v404_v11 }
  0xd4   : > { %v605_v12 = vpop.f32.mrf.mxu1 }
  0xd5   : > { %v403_v15 = vmul.f32 %v605_v12, %v605_v12 }
  0xd6   : > { %v393_v13 = vpop.f32.mrf.mxu1  ;;  %v594_v16 = vpop.f32.mrf.mxu0 }
  0xd7   : > { %v402_v14 = vmul.f32 %v393_v13, %v393_v13  ;;  %v320_v26 = vadd.f32 %v594_v16, %v559_v22 }
  0xd8   : > { %v314_v17 = vpop.f32.mrf.mxu0 }
  0xd9   : > { %610 = vmatprep.mubr.msk.f32.mxu0 %vm406_vm1, %v402_v14  ;;  %v315_v24 = vadd.f32 %v559_v22, %v314_v17 }
  0xda   : > { %611 = vmatmul.mubr.msk.f32.vlgmr.msra.gmra.mxu0 %vm406_vm1, %v403_v15 }
 0x19a   : > { %v612_v18 = vpop.f32.mrf.mxu0 }
 0x19b   : > { %v485_v19 = vadd.f32 1e-05, %v612_v18 }
 0x19c   : > { %v479_v20 = vpop.f32.mrf.mxu0 }
 0x19d   : > { %v480_v21 = vadd.f32 1e-05, %v479_v20  ;;  %621 = vrsqrt.f32 %v485_v19 }
 0x19f   : > { %623 = vrsqrt.f32 %v480_v21 }
 0x1aa   : > { %v622_v23 = vpop.eup %621 }
 0x1ab   : > { %v491_v28 = vmul.f32 %v622_v23, %v320_v26 }
 0x1ac   : > { %v624_v25 = vpop.eup %623 }
 0x1ad   : > { %v490_v27 = vmul.f32 %v624_v25, %v315_v24  ;;  %493 = vst.msk [vmem:[%s226_s26 + $0x8] sm:$0xff] %vm406_vm1, %v491_v28 }
 0x1af   : > { %492 = vst.msk [vmem:[%s226_s26] sm:$0xff] %vm406_vm1, %v490_v27 }
 0x1b0 PF: > { %s15_s18 = sadd.s32 1, %s631_s18  }
 0x1b1   : > { %p12_p4 = scmp.ge.s32.totalorder %s15_s18, 4  }
 0x1b3   :  { %14 = sbr.rel (!%p12_p4) target bundleno = 1 (0x1), region = 70 }

</bundles_post_ra>
